<compile_context>
chip_gen: v7x
topology: tpu7x:2x2x1
jax: 0.10.0
libtpu: 0.0.40
codegen_flags: <defaults>
</compile_context>

<pallas_src>
import jax
import jax.numpy as jnp
from jax.experimental import pallas as pl
from jax.experimental.pallas import tpu as pltpu

LANE = 128
SUB_BF16 = 16   # bf16 packs 16 rows per vreg sublane group


def _round_up(n, m):
    return ((n + m - 1) // m) * m


def _padded_bytes(shape, dtype):
    """VMEM footprint of one buffer (last dim -> 128 lanes, 2nd-last -> 8 sublanes)."""
    shape = tuple(shape)
    if len(shape) == 1:
        shape = (1,) + shape
    lead = 1
    for d in shape[:-2]:
        lead *= int(d)
    r = _round_up(int(shape[-2]), 8)
    c = _round_up(int(shape[-1]), 128)
    return lead * r * c * jnp.dtype(dtype).itemsize


def _vmem_limit(buffers, slack=2 << 20, cap=64 << 20):
    """buffers: iterable of (shape, dtype, n_buffers). Returns an int byte limit."""
    total = slack
    for shape, dtype, nbuf in buffers:
        total += nbuf * _padded_bytes(shape, dtype)
    return int(min(total, cap))


# --------------------------------------------------------------------------
# Kernel A: hoisted input projections for all time steps (row-tiled, parallel)
# --------------------------------------------------------------------------
def iproj_kernel(x_ref, wih_ref, bi_ref, iproj_ref):
    iproj_ref[...] = (
        jnp.dot(x_ref[...], wih_ref[...], preferred_element_type=jnp.float32)
        + bi_ref[...]).astype(iproj_ref.dtype)


# --------------------------------------------------------------------------
# Kernel B: GRU recurrence over time chunks (+ fused linear1/ReLU epilogue)
# --------------------------------------------------------------------------
def gru_rec_kernel(iproj_ref, lens_ref, whh_ref, bhn_ref, w1_ref, b1_ref,
                   x1_ref, h_ref):
    """iproj_ref: (T_CHUNK*B, 3H) bf16 block of this chunk's input projections.
    h_ref: (B, H) f32 persistent scratch carrying the hidden state across the grid."""
    c = pl.program_id(0)
    B = lens_ref.shape[0]          # padded batch (multiple of 16)
    H = whh_ref.shape[0]           # padded hidden size (multiple of 128)
    t_chunk = iproj_ref.shape[0] // B

    @pl.when(c == 0)
    def _():
        h_ref[...] = jnp.zeros_like(h_ref)

    # Loop invariants loaded once per chunk.
    lens = lens_ref[...]           # (B, 1) int32
    whh = whh_ref[...]             # (H, 3H) bf16
    bhn = bhn_ref[...]             # (1, H)  f32
    t0 = c * t_chunk               # global time offset of this chunk

    def step(tt, h_prev):
        row = pl.multiple_of(tt * B, 8)
        i_all = iproj_ref[pl.ds(row, B), :].astype(jnp.float32)   # (B, 3H)
        # TODO(synk): a further latency cut would hold whh in the MXU across
        # steps via pltpu.matmul_push_rhs/matmul_acc_lhs/matmul_pop; kept as
        # jnp.dot for lowering robustness across v5e/v6e/v7x.
        h_all = jnp.dot(h_prev.astype(jnp.bfloat16), whh,
                        preferred_element_type=jnp.float32)       # (B, 3H)
        r = jax.nn.sigmoid(i_all[:, 0:H] + h_all[:, 0:H])
        z = jax.nn.sigmoid(i_all[:, H:2 * H] + h_all[:, H:2 * H])
        n = jnp.tanh(i_all[:, 2 * H:3 * H] + r * (h_all[:, 2 * H:3 * H] + bhn))
        h_new = (1.0 - z) * n + z * h_prev
        # packed-sequence semantics: freeze h once t >= len[b]
        return jnp.where(t0 + tt < lens, h_new, h_prev)

    unroll = t_chunk if t_chunk <= 4 else 4      # partial unroll, no spill risk
    h_ref[...] = jax.lax.fori_loop(0, t_chunk, step, h_ref[...], unroll=unroll)

    @pl.when(c == pl.num_programs(0) - 1)
    def _():
        x1 = jnp.maximum(
            jnp.dot(h_ref[...].astype(jnp.bfloat16), w1_ref[...],
                    preferred_element_type=jnp.float32) + b1_ref[...], 0.0)
        x1_ref[...] = x1.astype(x1_ref.dtype)


# --------------------------------------------------------------------------
# Kernel C: item-tiled MLP head (linear2)
# --------------------------------------------------------------------------
def head_kernel(x1_ref, w2_ref, b2_ref, scores_ref):
    scores_ref[...] = (
        jnp.dot(x1_ref[...], w2_ref[...], preferred_element_type=jnp.float32)
        + b2_ref[...])


# --------------------------------------------------------------------------
# Wrapper
# --------------------------------------------------------------------------
def vanilla_gru_forward(params, user, item, sample_len, *,
                        tile_i=1024, chunk_vmem_bytes=2 << 20):
    """Forward pass of VanillaGRU_v0. `user` is unused (matches the PyTorch forward)."""
    # Embedding gather (glue, plain JAX). Dropout == identity (inference).
    x = params["item_emb"][item].astype(jnp.float32)   # (B, T, E)
    B, T, E = x.shape
    H = params["whh"].shape[-1]
    H2 = params["w1"].shape[-1]
    I = params["w2"].shape[-1]

    B_pad = max(_round_up(B, SUB_BF16), SUB_BF16)
    H_pad = _round_up(H, LANE)
    H2_pad = _round_up(H2, LANE)
    G = 3 * H_pad

    # Time chunking: bound the streamed bf16 iproj block to ~chunk_vmem_bytes
    # per buffer, independent of total T (keeps v7x's 64 MiB VMEM safe).
    t_chunk = max(1, min(T, chunk_vmem_bytes // (B_pad * G * 2)))
    t_chunk = min(t_chunk, 128)
    T_pad = _round_up(T, t_chunk)
    n_chunks = T_pad // t_chunk
    ROWS = t_chunk * B_pad          # rows per iproj / projection tile

    I_pad128 = _round_up(I, LANE)
    TILE_I = _round_up(min(tile_i, I_pad128), LANE)
    I_pad = _round_up(I, TILE_I)

    def pad2(a, r, c):
        return jnp.pad(a, ((0, r - a.shape[0]), (0, c - a.shape[1])))

    # ---- one-time weight staging (fused + padded, lane-dense, bf16 operands)
    wih, whh = params["wih"], params["whh"]            # (3, E, H), (3, H, H)
    bih, bhh = params["bih"], params["bhh"]            # (3, 1, H)
    wih_f = jnp.concatenate([pad2(wih[g], E, H_pad) for g in range(3)], axis=1)
    whh_f = jnp.concatenate([pad2(whh[g], H_pad, H_pad) for g in range(3)], axis=1)
    bi = jnp.concatenate([pad2(bih[0] + bhh[0], 1, H_pad),     # r: fold bih+bhh
                          pad2(bih[1] + bhh[1], 1, H_pad),     # z: fold bih+bhh
                          pad2(bih[2], 1, H_pad)], axis=1)     # n: input bias only
    bhn = pad2(bhh[2], 1, H_pad)                               # n: hidden bias (under r*)
    w1 = pad2(params["w1"], H_pad, H2_pad)
    b1 = pad2(params["b1"], 1, H2_pad)
    w2 = pad2(params["w2"], H2_pad, I_pad)
    b2 = pad2(params["b2"], 1, I_pad)

    # ---- inputs: time-major, batch/time-padded, flattened, bf16 MXU operands
    x = jnp.transpose(x, (1, 0, 2))                             # (T, B, E)
    x = jnp.pad(x, ((0, T_pad - T), (0, B_pad - B), (0, 0)))    # padded steps are frozen
    x_flat = x.reshape(T_pad * B_pad, E).astype(jnp.bfloat16)
    lens = jnp.pad(sample_len.astype(jnp.int32), (0, B_pad - B)).reshape(B_pad, 1)

    # ---- kernel A: all-timestep input projection (parallel row tiles, bf16 out)
    vmem_proj = _vmem_limit([((ROWS, E), jnp.bfloat16, 2),
                             ((E, G), jnp.bfloat16, 2),
                             ((1, G), jnp.float32, 2),
                             ((ROWS, G), jnp.bfloat16, 2)])
    iproj = pl.pallas_call(
        iproj_kernel,
        out_shape=jax.ShapeDtypeStruct((T_pad * B_pad, G), jnp.bfloat16),
        grid=(n_chunks,),
        in_specs=[
            pl.BlockSpec((ROWS, E), lambda c: (c, 0)),
            pl.BlockSpec((E, G), lambda c: (0, 0)),
            pl.BlockSpec((1, G), lambda c: (0, 0)),
        ],
        out_specs=pl.BlockSpec((ROWS, G), lambda c: (c, 0)),
        compiler_params=pltpu.CompilerParams(
            dimension_semantics=("parallel",), vmem_limit_bytes=vmem_proj),
    )(x_flat, wih_f.astype(jnp.bfloat16), bi.astype(jnp.float32))

    # ---- kernel B: recurrence over time chunks, h persistent in VMEM scratch
    vmem_rec = _vmem_limit([((ROWS, G), jnp.bfloat16, 2),
                            ((B_pad, 1), jnp.int32, 2),
                            ((H_pad, G), jnp.bfloat16, 2),
                            ((1, H_pad), jnp.float32, 2),
                            ((H_pad, H2_pad), jnp.bfloat16, 2),
                            ((1, H2_pad), jnp.float32, 2),
                            ((B_pad, H2_pad), jnp.bfloat16, 2),
                            ((B_pad, H_pad), jnp.float32, 1)])
    x1 = pl.pallas_call(
        gru_rec_kernel,
        out_shape=jax.ShapeDtypeStruct((B_pad, H2_pad), jnp.bfloat16),
        grid=(n_chunks,),
        in_specs=[
            pl.BlockSpec((ROWS, G), lambda c: (c, 0)),         # streamed iproj chunk
            pl.BlockSpec((B_pad, 1), lambda c: (0, 0)),        # lens
            pl.BlockSpec((H_pad, G), lambda c: (0, 0)),        # whh
            pl.BlockSpec((1, H_pad), lambda c: (0, 0)),        # bhn
            pl.BlockSpec((H_pad, H2_pad), lambda c: (0, 0)),   # w1
            pl.BlockSpec((1, H2_pad), lambda c: (0, 0)),       # b1
        ],
        out_specs=pl.BlockSpec((B_pad, H2_pad), lambda c: (0, 0)),
        scratch_shapes=[pltpu.VMEM((B_pad, H_pad), jnp.float32)],
        compiler_params=pltpu.CompilerParams(
            dimension_semantics=("arbitrary",), vmem_limit_bytes=vmem_rec),
    )(iproj, lens, whh_f.astype(jnp.bfloat16), bhn.astype(jnp.float32),
      w1.astype(jnp.bfloat16), b1.astype(jnp.float32))

    # ---- kernel C: item-tiled head (pure HBM streaming of w2)
    vmem_head = _vmem_limit([((B_pad, H2_pad), jnp.bfloat16, 2),
                             ((H2_pad, TILE_I), jnp.bfloat16, 2),
                             ((1, TILE_I), jnp.float32, 2),
                             ((B_pad, TILE_I), jnp.float32, 2)])
    scores_pad = pl.pallas_call(
        head_kernel,
        out_shape=jax.ShapeDtypeStruct((B_pad, I_pad), jnp.float32),
        grid=(I_pad // TILE_I,),
        in_specs=[
            pl.BlockSpec((B_pad, H2_pad), lambda i: (0, 0)),
            pl.BlockSpec((H2_pad, TILE_I), lambda i: (0, i)),
            pl.BlockSpec((1, TILE_I), lambda i: (0, i)),
        ],
        out_specs=pl.BlockSpec((B_pad, TILE_I), lambda i: (0, i)),
        compiler_params=pltpu.CompilerParams(
            dimension_semantics=("parallel",), vmem_limit_bytes=vmem_head),
    )(x1, w2.astype(jnp.bfloat16), b2.astype(jnp.float32))

    return scores_pad[:B, :I]


# --------------------------------------------------------------------------
# Pure-JAX reference (same math, no Pallas) for a sanity check.
# --------------------------------------------------------------------------
def reference_forward(params, user, item, sample_len):
    x = params["item_emb"][item].astype(jnp.float32)   # (B, T, E)
    B, T, _ = x.shape
    H = params["whh"].shape[-1]
    h = jnp.zeros((B, H), jnp.float32)
    lens = sample_len.astype(jnp.int32)
    for t in range(T):
        x_t = x[:, t]
        i_r = x_t @ params["wih"][0] + params["bih"][0]
        i_z = x_t @ params["wih"][1] + params["bih"][1]
        i_n = x_t @ params["wih"][2] + params["bih"][2]
        h_r = h @ params["whh"][0] + params["bhh"][0]
        h_z = h @ params["whh"][1] + params["bhh"][1]
        h_n = h @ params["whh"][2] + params["bhh"][2]
        r = jax.nn.sigmoid(i_r + h_r)
        z = jax.nn.sigmoid(i_z + h_z)
        n = jnp.tanh(i_n + r * h_n)
        h_new = (1.0 - z) * n + z * h
        h = jnp.where((t < lens)[:, None], h_new, h)
    x1 = jnp.maximum(h @ params["w1"] + params["b1"], 0.0)
    return x1 @ params["w2"] + params["b2"]


def init_params(key, user_num, item_num, embed_size, hidden_size):
    ks = jax.random.split(key, 10)
    s = 0.1
    item_emb = jax.random.normal(ks[0], (item_num + 1, embed_size), jnp.float32) * s
    item_emb = item_emb.at[0].set(0.0)  # padding_idx=0
    return {
        "user_emb": jax.random.normal(ks[9], (user_num, embed_size), jnp.float32) * s,  # unused
        "item_emb": item_emb,
        "wih": jax.random.normal(ks[1], (3, embed_size, hidden_size), jnp.float32) * s,
        "whh": jax.random.normal(ks[2], (3, hidden_size, hidden_size), jnp.float32) * s,
        "bih": jax.random.normal(ks[3], (3, 1, hidden_size), jnp.float32) * s,
        "bhh": jax.random.normal(ks[4], (3, 1, hidden_size), jnp.float32) * s,
        "w1": jax.random.normal(ks[5], (hidden_size, hidden_size // 2), jnp.float32) * s,
        "b1": jax.random.normal(ks[6], (1, hidden_size // 2), jnp.float32) * s,
        "w2": jax.random.normal(ks[7], (hidden_size // 2, item_num), jnp.float32) * s,
        "b2": jax.random.normal(ks[8], (1, item_num), jnp.float32) * s,
    }


if __name__ == "__main__":
    # Small config consistent with the module's constructor
    B, T = 8, 8
    embed_size, hidden_size = 16, 32
    user_num, item_num = 10, 64

    key = jax.random.PRNGKey(0)
    pkey, ukey, ikey = jax.random.split(key, 3)
    params = init_params(pkey, user_num, item_num, embed_size, hidden_size)

    user = jax.random.randint(ukey, (B,), 0, user_num)
    # pack_padded_sequence (enforce_sorted default) expects descending lengths
    sample_len = jnp.array([8, 8, 7, 6, 5, 4, 3, 2], dtype=jnp.int32)
    item = jax.random.randint(ikey, (B, T), 1, item_num + 1)
    # positions beyond each sequence length use padding index 0
    item = jnp.where(jnp.arange(T)[None, :] < sample_len[:, None], item, 0)

    scores = vanilla_gru_forward(params, user, item, sample_len)
    scores = jax.block_until_ready(scores)

    ref = reference_forward(params, user, item, sample_len)
    assert scores.shape == (B, item_num)
    assert jnp.allclose(scores, ref, rtol=2e-2, atol=2e-2), "mismatch vs pure-JAX reference"
    # TODO(synk): F.dropout (train-mode stochastic masking) has no deterministic
    # equivalent here; it is treated as identity (inference semantics).
    print("KERNEL_OK")
</pallas_src>

<mosaic_0001>
module attributes {stable_mosaic.version = 11 : i64} {
  func.func @iproj_kernel(%arg0: i32, %arg1: memref<128x16xbf16, #tpu.memory_space<vmem>>, %arg2: memref<16x384xbf16, #tpu.memory_space<vmem>>, %arg3: memref<1x384xf32, #tpu.memory_space<vmem>>, %arg4: memref<128x384xbf16, #tpu.memory_space<vmem>>) attributes {dimension_semantics = [#tpu.dimension_semantics<parallel>], iteration_bounds = array<i64: 1>, scalar_prefetch = 0 : i64, scratch_operands = 0 : i64, tpu.core_type = #tpu.core_type<tc>, window_params = [{transform_indices = @transform_0, window_bounds = array<i64: 128, 16>}, {pipeline_mode = #tpu.pipeline_mode<synchronous>, transform_indices = @transform_1, window_bounds = array<i64: 16, 384>}, {pipeline_mode = #tpu.pipeline_mode<synchronous>, transform_indices = @transform_2, window_bounds = array<i64: 1, 384>}, {transform_indices = @transform_3, window_bounds = array<i64: 128, 384>}]} {
    %c0 = arith.constant 0 : index
    %c0_0 = arith.constant 0 : index
    %0 = vector.load %arg1[%c0, %c0_0] : memref<128x16xbf16, #tpu.memory_space<vmem>>, vector<128x16xbf16>
    %c0_1 = arith.constant 0 : index
    %c0_2 = arith.constant 0 : index
    %1 = vector.load %arg2[%c0_1, %c0_2] : memref<16x384xbf16, #tpu.memory_space<vmem>>, vector<16x384xbf16>
    %cst = arith.constant dense<0.000000e+00> : vector<128x384xf32>
    %2 = tpu.matmul %0, %1, %cst {dimension_numbers = #tpu.dot_dimension_numbers<[1], [0], [0], [1], [0, 0, 1, 1], [], []>} : vector<128x16xbf16>, vector<16x384xbf16>, vector<128x384xf32> -> vector<128x384xf32>
    %c0_3 = arith.constant 0 : index
    %c0_4 = arith.constant 0 : index
    %3 = vector.load %arg3[%c0_3, %c0_4] : memref<1x384xf32, #tpu.memory_space<vmem>>, vector<1x384xf32>
    %4 = vector.broadcast %3 : vector<1x384xf32> to vector<128x384xf32>
    %5 = arith.addf %2, %4 : vector<128x384xf32>
    %6 = arith.truncf %5 : vector<128x384xf32> to vector<128x384xbf16>
    %c0_5 = arith.constant 0 : index
    %c0_6 = arith.constant 0 : index
    %7 = vector.load %arg4[%c0_5, %c0_6] : memref<128x384xbf16, #tpu.memory_space<vmem>>, vector<128x384xbf16>
    tpu.vector_store %arg4[%c0_5, %c0_6], %6 {strides = array<i32>} : memref<128x384xbf16, #tpu.memory_space<vmem>>, vector<128x384xbf16>,
    return
  }
  func.func @transform_0(%arg0: i32) -> (i32, i32) {
    %c0_i32 = arith.constant 0 : i32
    %c0_i32_0 = arith.constant 0 : i32
    return %arg0, %c0_i32 : i32, i32
  }
  func.func @transform_1(%arg0: i32) -> (i32, i32) {
    %c0_i32 = arith.constant 0 : i32
    %c0_i32_0 = arith.constant 0 : i32
    %c0_i32_1 = arith.constant 0 : i32
    return %c0_i32, %c0_i32_0 : i32, i32
  }
  func.func @transform_2(%arg0: i32) -> (i32, i32) {
    %c0_i32 = arith.constant 0 : i32
    %c0_i32_0 = arith.constant 0 : i32
    %c0_i32_1 = arith.constant 0 : i32
    return %c0_i32, %c0_i32_0 : i32, i32
  }
  func.func @transform_3(%arg0: i32) -> (i32, i32) {
    %c0_i32 = arith.constant 0 : i32
    %c0_i32_0 = arith.constant 0 : i32
    return %arg0, %c0_i32 : i32, i32
  }
}

</mosaic_0001>

<bundles_post_ra>
// kernel: tpu_custom_call.1
= control target key start
LH: loop header
LB: loop body
LE: loop exit
PB: predicated region body
PF: predicated region fallthrough
CT: control target
= control target key end

     0   :  { %v712_v2 = vmov 0   ;;  %vm109_vm0 = vcmask 130048   ;;  %s854_s0 = inlined_call_operand.vmem [shape: bf16[128,16], index: 0, kind: input, shape index: {}]   ;;  %s855_s1 = inlined_call_operand.vmem [shape: bf16[16,384], index: 1, kind: input, shape index: {}]   ;;  %s856_s2 = inlined_call_operand.vmem [shape: f32[1,384], index: 2, kind: input, shape index: {}]   ;;  %s857_s3 = inlined_call_operand.hbm [shape: bf16[128,384], index: 3, kind: output, shape index: {}]  }
   0x1   :  { %v676_v0 = vld [vmem:[%s855_s1 + $0x4] ss:$12 sps:$4 sm:$0xff]   ;;  %v678_v1 = vld [vmem:[%s855_s1] ss:$12 sps:$4 sm:$0xff]   ;;  %166 = vmatprep.mubr.bf16.mxu0 %v712_v2  ;;  %226 = vmatprep.mubr.bf16.mxu1 %v712_v2  ;;  %v681_v5 = vld [vmem:[%s855_s1 + $0x8] ss:$12 sps:$4 sm:$0xff]  }
   0x2   :  { %134 = vmatprep.subr.bf16.mxu0 %v676_v0  ;;  %670 = vmatprep.subr.bf16.mxu1 %v676_v0  ;;  %v679_v3 = vld [vmem:[%s854_s0] sm:$0xff]   ;;  %v680_v4 = vld [vmem:[%s854_s0 + $0x30] sm:$0xff]   ;;  %v682_v6 = vld [vmem:[%s854_s0 + $0x8] sm:$0xff]  }
   0x3   :  { %135 = vmatpush1.bf16.msra.mxu0 %v678_v1  ;;  %671 = vmatpush1.bf16.msra.mxu1 %v678_v1  ;;  %v683_v7 = vld [vmem:[%s854_s0 + $0x38] sm:$0xff]  }
   0x4   :  { %652 = vmatprep.subr.bf16.mxu1 %v681_v5 }
   0x6   :  { %563 = vmatmul.mubr.msk.bf16.vlgmr.msra.gmra.mrb[0].mxu0 %vm109_vm0, %v679_v3  ;;  %569 = vmatmul.mubr.msk.bf16.vlgmr.msra.gmra.mrb[0].mxu1 %vm109_vm0, %v680_v4 }
   0x7   :  { %176 = vmatprep.mubr.bf16.mxu0 %v712_v2  ;;  %653 = vmatpush3.bf16.msra.mxu1 %v681_v5 }
   0x8   :  { %236 = vmatprep.mubr.bf16.mxu1 %v712_v2 }
   0x9   :  { %8 = vsyncpa [#allocation3], 0  ;;  %v684_v8 = vld [vmem:[%s854_s0 + $0x10] sm:$0xff]   ;;  %v685_v9 = vld [vmem:[%s854_s0 + $0x18] sm:$0xff]   ;;  %v38_v12 = vlaneseq }
   0xa   :  { %v686_v10 = vld [vmem:[%s854_s0 + $0x20] sm:$0xff]   ;;  %v687_v11 = vld [vmem:[%s854_s0 + $0x28] sm:$0xff]   ;;  %s713_s0 = smov [#allocation2]  }
   0xb   :  { %v39_v13 = vshrl.u32 %v38_v12, 7  ;;  %v36_v15 = vld [vmem:[%s856_s2] sm:$0x7]  ;;  %s541_s2 = sshll.u32 %s713_s0, 4  ;;  %s542_s2 = int_to_ptr.vmem [resolvable:$true] %s541_s2 }
   0xc   :  { %s688_s8 = scalar_lea.vmem %s542_s2, 3072  ;;  %p693_p1 = scmp.lt.s32.totalorder %s542_s2, %s542_s2 }
   0xd   :  { %v40_v14 = vsub.s32 0, %v39_v13  ;;  %v44_v16 = vsub.s32 1, %v39_v13  ;;  %v48_v45 = vsub.s32 2, %v39_v13  ;;  %p689_p0 = scmp.ne.s32.totalorder %s542_s2, %s688_s8  ;;  %p694_p2 = scmp.lt.s32.totalorder %s688_s8, %s688_s8 }
   0xe   :  { %564 = vmatmul.mubr.msk.bf16.gmra.mrb[4].mxu0 %vm109_vm0, %v682_v6  ;;  %570 = vmatmul.mubr.msk.bf16.gmra.mrb[4].mxu1 %vm109_vm0, %v683_v7 }
   0xf   :  { %186 = vmatprep.mubr.bf16.mxu0 %v712_v2  ;;  %654 = vmatprep.mubr.msk.bf16.mxu1 %vm109_vm0, %v679_v3  ;;  %v788_v17 = vrot.slane %v36_v15, %v40_v14  ;;  %v790_v18 = vrot.slane %v36_v15, %v44_v16  ;;  %v808_v58 = vrot.slane %v36_v15, %v48_v45  ;;  %p695_p3 = por %p694_p2, %p693_p1 }
  0x11   :  { %p696_p4 = pnand %p695_p3, %p689_p0 }
  0x16   :  { %565 = vmatmul.mubr.msk.bf16.gmra.mrb[8].mxu0 %vm109_vm0, %v684_v8  ;;  %655 = vmatmul.mubr.msk.bf16.vlgmr.msra.gmra.mrb[8].mxu1 %vm109_vm0, %v682_v6 }
  0x17   :  { %196 = vmatprep.mubr.bf16.mxu0 %v712_v2  ;;  %658 = vmatprep.mubr.msk.bf16.mxu1 %vm109_vm0, %v684_v8 }
  0x1e   :  { %566 = vmatmul.mubr.msk.bf16.gmra.mrb[12].mxu0 %vm109_vm0, %v685_v9  ;;  %659 = vmatmul.mubr.msk.bf16.gmra.mrb[12].mxu1 %vm109_vm0, %v685_v9 }
  0x1f   :  { %206 = vmatprep.mubr.bf16.mxu0 %v712_v2  ;;  %662 = vmatprep.mubr.msk.bf16.mxu1 %vm109_vm0, %v686_v10 }
  0x26   :  { %567 = vmatmul.mubr.msk.bf16.gmra.mrb[16].mxu0 %vm109_vm0, %v686_v10  ;;  %663 = vmatmul.mubr.msk.bf16.gmra.mrb[16].mxu1 %vm109_vm0, %v687_v11 }
  0x27   :  { %216 = vmatprep.mubr.bf16.mxu0 %v712_v2  ;;  %666 = vmatprep.mubr.msk.bf16.mxu1 %vm109_vm0, %v680_v4 }
  0x2e   :  { %568 = vmatmul.mubr.msk.bf16.gmra.mrb[20].mxu0 %vm109_vm0, %v687_v11  ;;  %667 = vmatmul.mubr.msk.bf16.gmra.mrb[20].mxu1 %vm109_vm0, %v683_v7 }
  0xd9   :  { %v168_v19 = vpop.f32.mrb[0].mxu0  ;;  %v228_v20 = vpop.f32.mrb[0].mxu1 }
  0xda   :  { %v169_v21 = vadd.f32 %v168_v19, %v788_v17  ;;  %v229_v22 = vadd.f32 %v228_v20, %v788_v17  ;;  %v170_v23 = vpop.f32.mrb[1].mxu0  ;;  %v230_v24 = vpop.f32.mrb[1].mxu1 }
  0xdb   :  { %v171_v25 = vadd.f32 %v170_v23, %v790_v18  ;;  %v231_v26 = vadd.f32 %v230_v24, %v790_v18  ;;  %v172_v27 = vpop.f32.mrb[2].mxu0  ;;  %v232_v28 = vpop.f32.mrb[2].mxu1 }
  0xdc   :  { %v173_v29 = vadd.f32 %v172_v27, %v788_v17  ;;  %v233_v30 = vadd.f32 %v232_v28, %v788_v17  ;;  %v174_v31 = vpop.f32.mrb[3].mxu0  ;;  %v234_v32 = vpop.f32.mrb[3].mxu1 }
  0xdd   :  { %v611_v33 = vpack.c.bf16 %v171_v25, %v169_v21  ;;  %v635_v34 = vpack.c.bf16 %v231_v26, %v229_v22  ;;  %v175_v35 = vadd.f32 %v174_v31, %v790_v18  ;;  %v235_v36 = vadd.f32 %v234_v32, %v790_v18 }
  0xdf   :  { %504 = vst [vmem:[#allocation2] sm:$0xff] %v611_v33  ;;  %528 = vst [vmem:[#allocation2 + $0x90] sm:$0xff] %v635_v34  ;;  %v613_v37 = vpack.c.bf16 %v175_v35, %v173_v29  ;;  %v637_v38 = vpack.c.bf16 %v235_v36, %v233_v30 }
  0xe1   :  { %506 = vst [vmem:[#allocation2 + $0xc] sm:$0xff] %v613_v37  ;;  %530 = vst [vmem:[#allocation2 + $0x9c] sm:$0xff] %v637_v38  ;;  %v178_v39 = vpop.f32.mrb[4].mxu0  ;;  %v238_v40 = vpop.f32.mrb[4].mxu1 }
  0xe2   :  { %v179_v41 = vadd.f32 %v178_v39, %v788_v17  ;;  %v239_v42 = vadd.f32 %v238_v40, %v788_v17  ;;  %v180_v43 = vpop.f32.mrb[5].mxu0  ;;  %v240_v44 = vpop.f32.mrb[5].mxu1 }
  0xe3   :  { %v181_v46 = vadd.f32 %v180_v43, %v790_v18  ;;  %v241_v47 = vadd.f32 %v240_v44, %v790_v18  ;;  %v182_v48 = vpop.f32.mrb[6].mxu0  ;;  %v242_v49 = vpop.f32.mrb[6].mxu1 }
  0xe4   :  { %v183_v50 = vadd.f32 %v182_v48, %v788_v17  ;;  %v243_v51 = vadd.f32 %v242_v49, %v788_v17  ;;  %v184_v52 = vpop.f32.mrb[7].mxu0  ;;  %v244_v53 = vpop.f32.mrb[7].mxu1 }
  0xe5   :  { %v615_v54 = vpack.c.bf16 %v181_v46, %v179_v41  ;;  %v639_v55 = vpack.c.bf16 %v241_v47, %v239_v42  ;;  %v185_v56 = vadd.f32 %v184_v52, %v790_v18  ;;  %v245_v57 = vadd.f32 %v244_v53, %v790_v18 }
  0xe7   :  { %508 = vst [vmem:[#allocation2 + $0x18] sm:$0xff] %v615_v54  ;;  %532 = vst [vmem:[#allocation2 + $0xa8] sm:$0xff] %v639_v55  ;;  %v617_v59 = vpack.c.bf16 %v185_v56, %v183_v50  ;;  %v641_v60 = vpack.c.bf16 %v245_v57, %v243_v51 }
  0xe9   :  { %510 = vst [vmem:[#allocation2 + $0x24] sm:$0xff] %v617_v59  ;;  %534 = vst [vmem:[#allocation2 + $0xb4] sm:$0xff] %v641_v60  ;;  %v188_v61 = vpop.f32.mrb[8].mxu0  ;;  %v656_v62 = vpop.f32.mrb[8].mxu1 }
  0xea   :  { %v189_v63 = vadd.f32 %v188_v61, %v788_v17  ;;  %v290_v0 = vadd.f32 %v656_v62, %v808_v58  ;;  %v190_v1 = vpop.f32.mrb[9].mxu0  ;;  %v281_v2 = vpop.f32.mrb[9].mxu1 }
  0xeb   :  { %v191_v3 = vadd.f32 %v190_v1, %v790_v18  ;;  %v282_v4 = vadd.f32 %v281_v2, %v808_v58  ;;  %v192_v5 = vpop.f32.mrb[10].mxu0  ;;  %v657_v6 = vpop.f32.mrb[10].mxu1 }
  0xec   :  { %v616_v7 = vpack.c.bf16 %v290_v0, %v290_v0  ;;  %v193_v8 = vadd.f32 %v192_v5, %v788_v17  ;;  %v293_v9 = vadd.f32 %v657_v6, %v808_v58  ;;  %v194_v10 = vpop.f32.mrb[11].mxu0  ;;  %v284_v11 = vpop.f32.mrb[11].mxu1 }
  0xed   :  { %v619_v12 = vpack.c.bf16 %v191_v3, %v189_v63  ;;  %v612_v13 = vpack.c.bf16 %v282_v4, %v282_v4  ;;  %v195_v14 = vadd.f32 %v194_v10, %v790_v18  ;;  %v285_v15 = vadd.f32 %v284_v11, %v808_v58 }
  0xee   :  { %509 = vst [vmem:[#allocation2 + $0x20] sm:$0xf] %v616_v7  ;;  %v618_v16 = vpack.c.bf16 %v293_v9, %v293_v9 }
  0xef   :  { %512 = vst [vmem:[#allocation2 + $0x30] sm:$0xff] %v619_v12  ;;  %505 = vst [vmem:[#allocation2 + $0x8] sm:$0xf] %v612_v13  ;;  %v621_v19 = vpack.c.bf16 %v195_v14, %v193_v8  ;;  %v614_v20 = vpack.c.bf16 %v285_v15, %v285_v15 }
  0xf0   :  { %511 = vst [vmem:[#allocation2 + $0x2c] sm:$0xf] %v618_v16 }
  0xf1   :  { %514 = vst [vmem:[#allocation2 + $0x3c] sm:$0xff] %v621_v19  ;;  %507 = vst [vmem:[#allocation2 + $0x14] sm:$0xf] %v614_v20  ;;  %v198_v21 = vpop.f32.mrb[12].mxu0  ;;  %v660_v22 = vpop.f32.mrb[12].mxu1 }
  0xf2   :  { %v199_v23 = vadd.f32 %v198_v21, %v788_v17  ;;  %v306_v24 = vadd.f32 %v660_v22, %v808_v58  ;;  %v200_v25 = vpop.f32.mrb[13].mxu0  ;;  %v297_v26 = vpop.f32.mrb[13].mxu1 }
  0xf3   :  { %v201_v27 = vadd.f32 %v200_v25, %v790_v18  ;;  %v298_v28 = vadd.f32 %v297_v26, %v808_v58  ;;  %v202_v29 = vpop.f32.mrb[14].mxu0  ;;  %v661_v30 = vpop.f32.mrb[14].mxu1 }
  0xf4   :  { %v624_v31 = vpack.c.bf16 %v306_v24, %v306_v24  ;;  %v203_v32 = vadd.f32 %v202_v29, %v788_v17  ;;  %v309_v33 = vadd.f32 %v661_v30, %v808_v58  ;;  %v204_v34 = vpop.f32.mrb[15].mxu0  ;;  %v300_v35 = vpop.f32.mrb[15].mxu1 }
  0xf5   :  { %v623_v36 = vpack.c.bf16 %v201_v27, %v199_v23  ;;  %v620_v37 = vpack.c.bf16 %v298_v28, %v298_v28  ;;  %v205_v38 = vadd.f32 %v204_v34, %v790_v18  ;;  %v301_v39 = vadd.f32 %v300_v35, %v808_v58 }
  0xf6   :  { %517 = vst [vmem:[#allocation2 + $0x50] sm:$0xf] %v624_v31  ;;  %v626_v40 = vpack.c.bf16 %v309_v33, %v309_v33 }
  0xf7   :  { %516 = vst [vmem:[#allocation2 + $0x48] sm:$0xff] %v623_v36  ;;  %513 = vst [vmem:[#allocation2 + $0x38] sm:$0xf] %v620_v37  ;;  %v625_v41 = vpack.c.bf16 %v205_v38, %v203_v32  ;;  %v622_v42 = vpack.c.bf16 %v301_v39, %v301_v39 }
  0xf8   :  { %519 = vst [vmem:[#allocation2 + $0x5c] sm:$0xf] %v626_v40 }
  0xf9   :  { %518 = vst [vmem:[#allocation2 + $0x54] sm:$0xff] %v625_v41  ;;  %515 = vst [vmem:[#allocation2 + $0x44] sm:$0xf] %v622_v42  ;;  %v208_v43 = vpop.f32.mrb[16].mxu0  ;;  %v664_v44 = vpop.f32.mrb[16].mxu1 }
  0xfa   :  { %v209_v45 = vadd.f32 %v208_v43, %v788_v17  ;;  %v322_v46 = vadd.f32 %v664_v44, %v808_v58  ;;  %v210_v47 = vpop.f32.mrb[17].mxu0  ;;  %v313_v48 = vpop.f32.mrb[17].mxu1 }
  0xfb   :  { %v211_v49 = vadd.f32 %v210_v47, %v790_v18  ;;  %v314_v50 = vadd.f32 %v313_v48, %v808_v58  ;;  %v212_v51 = vpop.f32.mrb[18].mxu0  ;;  %v665_v52 = vpop.f32.mrb[18].mxu1 }
  0xfc   :  { %v632_v53 = vpack.c.bf16 %v322_v46, %v322_v46  ;;  %v213_v54 = vadd.f32 %v212_v51, %v788_v17  ;;  %v325_v55 = vadd.f32 %v665_v52, %v808_v58  ;;  %v214_v56 = vpop.f32.mrb[19].mxu0  ;;  %v316_v57 = vpop.f32.mrb[19].mxu1 }
  0xfd   :  { %v627_v59 = vpack.c.bf16 %v211_v49, %v209_v45  ;;  %v628_v60 = vpack.c.bf16 %v314_v50, %v314_v50  ;;  %v215_v61 = vadd.f32 %v214_v56, %v790_v18  ;;  %v317_v62 = vadd.f32 %v316_v57, %v808_v58 }
  0xfe   :  { %525 = vst [vmem:[#allocation2 + $0x80] sm:$0xf] %v632_v53  ;;  %v634_v63 = vpack.c.bf16 %v325_v55, %v325_v55 }
  0xff   :  { %520 = vst [vmem:[#allocation2 + $0x60] sm:$0xff] %v627_v59  ;;  %521 = vst [vmem:[#allocation2 + $0x68] sm:$0xf] %v628_v60  ;;  %v629_v0 = vpack.c.bf16 %v215_v61, %v213_v54  ;;  %v630_v1 = vpack.c.bf16 %v317_v62, %v317_v62 }
 0x100   :  { %527 = vst [vmem:[#allocation2 + $0x8c] sm:$0xf] %v634_v63 }
 0x101   :  { %522 = vst [vmem:[#allocation2 + $0x6c] sm:$0xff] %v629_v0  ;;  %523 = vst [vmem:[#allocation2 + $0x74] sm:$0xf] %v630_v1  ;;  %v218_v2 = vpop.f32.mrb[20].mxu0  ;;  %v668_v3 = vpop.f32.mrb[20].mxu1 }
 0x102   :  { %v219_v4 = vadd.f32 %v218_v2, %v788_v17  ;;  %v338_v5 = vadd.f32 %v668_v3, %v808_v58  ;;  %v220_v6 = vpop.f32.mrb[21].mxu0  ;;  %v329_v7 = vpop.f32.mrb[21].mxu1 }
 0x103   :  { %v221_v8 = vadd.f32 %v220_v6, %v790_v18  ;;  %v330_v9 = vadd.f32 %v329_v7, %v808_v58  ;;  %v222_v10 = vpop.f32.mrb[22].mxu0  ;;  %v669_v11 = vpop.f32.mrb[22].mxu1 }
 0x104   :  { %v640_v12 = vpack.c.bf16 %v338_v5, %v338_v5  ;;  %v223_v13 = vadd.f32 %v222_v10, %v788_v17  ;;  %v341_v14 = vadd.f32 %v669_v11, %v808_v58  ;;  %v224_v15 = vpop.f32.mrb[23].mxu0  ;;  %v332_v16 = vpop.f32.mrb[23].mxu1 }
 0x105   :  { %v631_v19 = vpack.c.bf16 %v221_v8, %v219_v4  ;;  %v636_v20 = vpack.c.bf16 %v330_v9, %v330_v9  ;;  %v225_v21 = vadd.f32 %v224_v15, %v790_v18  ;;  %v333_v22 = vadd.f32 %v332_v16, %v808_v58 }
 0x106   :  { %533 = vst [vmem:[#allocation2 + $0xb0] sm:$0xf] %v640_v12  ;;  %v642_v23 = vpack.c.bf16 %v341_v14, %v341_v14 }
 0x107   :  { %524 = vst [vmem:[#allocation2 + $0x78] sm:$0xff] %v631_v19  ;;  %529 = vst [vmem:[#allocation2 + $0x98] sm:$0xf] %v636_v20  ;;  %v633_v24 = vpack.c.bf16 %v225_v21, %v223_v13  ;;  %v638_v25 = vpack.c.bf16 %v333_v22, %v333_v22 }
 0x108   :  { %535 = vst [vmem:[#allocation2 + $0xbc] sm:$0xf] %v642_v23 }
 0x109   :  { %526 = vst [vmem:[#allocation2 + $0x84] sm:$0xff] %v633_v24  ;;  %531 = vst [vmem:[#allocation2 + $0xa4] sm:$0xf] %v638_v25 }
 0x10a   :  { %699 = shalt.err (!%p696_p4)
}
 0x10b   :  { %s700_s11 = scalar_lea.hbm %s857_s3, 3072 }
 0x10c   :  { %p701_p5 = scmp.ne.s32.totalorder %s857_s3, %s700_s11  ;;  %p704_p6 = scmp.lt.u32.totalorder %s700_s11, %s857_s3 }
 0x10e   :  { %p706_p7 = pnand %p704_p6, %p701_p5 }
 0x110   :  { %709 = shalt.err (!%p706_p7)
}
 0x111   :  { %s714_s16 = smov 192   ;;  %s715_s17 = smov 12  }
 0x112   :  { %547 = dma.vmem_to_hbm [thread:$0]  %s542_s2, 3072, %s857_s3, [#allocation3], %s714_s16, %s714_s16, %s715_s17  }
 0x113   :  { %710 = dma.done.wait [#allocation3], 3072  }
 0x114   :  { %711 = vsyncadd [#allocation3], 4294964224 }
 0x115   :  { %551 = vsyncpa [#allocation3], 1 }

</bundles_post_ra>
